<compile_context>
chip_gen: v7x
topology: tpu7x:2x2x1
jax: 0.10.0
libtpu: 0.0.40
codegen_flags: <defaults>
</compile_context>

<pallas_src>
import math
import numpy as np
import jax
import jax.numpy as jnp
from jax.experimental import pallas as pl
from jax.experimental.pallas import tpu as pltpu


def _cdiv(a, b):
    return -(-a // b)


def _round_up(a, m):
    return _cdiv(a, m) * m


# ----------------------------------------------------------------------------
# Pallas kernel: fused 1x1-conv (channel mix) + bias + ReLU, spatial on lanes.
# ----------------------------------------------------------------------------
def _conv1x1_relu_kernel(x_ref, w_ref, b_ref, o_ref):
    # x_ref: (1, C_in, tS)   w_ref: (C_out, C_in)   b_ref: (C_out, 1)
    # o_ref: (1, C_out, tS)  -- tS (spatial) is the 128-lane axis: lane-dense I/O.
    c_in = x_ref.shape[1]

    x = x_ref[0].astype(jnp.float32)      # (C_in, tS)
    w = w_ref[...].astype(jnp.float32)    # (C_out, C_in)
    b = b_ref[...].astype(jnp.float32)    # (C_out, 1)

    # C_in is tiny (e.g. 4): unrolled VPU broadcast-FMAs (outer products) instead
    # of an MXU matmul with contraction depth 4. Accumulator initialized with the
    # first product -- saves one full-width zero-fill + add per step.
    acc = w[:, 0:1] * x[0:1, :]
    for ci in range(1, c_in):
        acc = acc + w[:, ci:ci + 1] * x[ci:ci + 1, :]

    y = acc + b                           # (C_out, tS) + (C_out, 1) lane-broadcast
    o_ref[0] = jnp.maximum(y, 0.0).astype(o_ref.dtype)


def conv1x1_relu(x_nchw, w, b, *, ts_max=65536, vmem_limit_bytes=32 * 1024 * 1024):
    """1x1 conv + bias + ReLU on an NCHW tensor via a lane-dense Pallas kernel.

    x_nchw: (N, C_in, H, W); w: (C_out, C_in); b: (C_out,)
    Works directly on NCHW (no layout transposes): out[n, :, hw] = relu(W @ x[n, :, hw] + b).
    No spatial padding / slicing in the wrapper: the ragged last tile is handled by
    Pallas (OOB writes of the partial block are dropped).
    """
    N, C_in, H, W = x_nchw.shape
    C_out, wc_in = w.shape
    assert wc_in == C_in
    HW = H * W

    x = x_nchw.reshape(N, C_in, HW)
    itemsize = x.dtype.itemsize

    # Clamp the per-step lane count so the double-buffered (in + out) blocks use at
    # most ~half of the 32 MiB scoped-VMEM budget (leaves headroom; safe on v7x).
    ts_cap = (vmem_limit_bytes // 4) // ((C_in + C_out) * itemsize)
    ts_cap = max(128, (ts_cap // 128) * 128)
    ts_max = min(int(ts_max), int(ts_cap))

    # Balanced spatial tiles: waste bounded to <128 lanes per tile.
    n_tiles = max(1, _cdiv(HW, ts_max))
    # v7x megacore: keep at least 2 parallel grid steps when possible.
    while N * n_tiles < 2 and n_tiles * 128 < HW:
        n_tiles += 1
    tS = _round_up(_cdiv(HW, n_tiles), 128)
    n_tiles = _cdiv(HW, tS)

    b2d = b.reshape(C_out, 1)
    grid = (N, n_tiles)

    out = pl.pallas_call(
        _conv1x1_relu_kernel,
        out_shape=jax.ShapeDtypeStruct((N, C_out, HW), x.dtype),
        grid_spec=pltpu.PrefetchScalarGridSpec(
            num_scalar_prefetch=0,
            grid=grid,
            in_specs=[
                # Activations: per-(n, spatial-tile) block, spatial on lanes.
                pl.BlockSpec((1, C_in, tS), lambda n, s: (n, 0, s)),
                # Weight / bias: constant index_map -> stays resident across steps.
                pl.BlockSpec((C_out, C_in), lambda n, s: (0, 0)),
                pl.BlockSpec((C_out, 1), lambda n, s: (0, 0)),
            ],
            out_specs=pl.BlockSpec((1, C_out, tS), lambda n, s: (n, 0, s)),
        ),
        compiler_params=pltpu.CompilerParams(
            # Both axes independent -> both TensorCores get work on v7x.
            dimension_semantics=("parallel", "parallel"),
            # Safe on v5e/v6e (128 MiB) and v7x (64 MiB physical).
            vmem_limit_bytes=vmem_limit_bytes,
        ),
    )(x, w, b2d)

    return out.reshape(N, C_out, H, W)


# ----------------------------------------------------------------------------
# Inner model (stand-in for the `model` passed to myModel.__init__)
# ----------------------------------------------------------------------------
class InnerConvModel:
    def __init__(self, c_in, c_out, key):
        k_w, k_b = jax.random.split(key)
        # Conv2d-style weight layout (C_out, C_in), kaiming-ish scale.
        self.w = (jax.random.normal(k_w, (c_out, c_in), jnp.float32)
                  * (1.0 / math.sqrt(c_in)))
        self.b = jax.random.normal(k_b, (c_out,), jnp.float32) * 0.01
        # One jit over the whole inner forward so reshapes fuse around the conv.
        self._fwd = jax.jit(lambda x, w, b: conv1x1_relu(x, w, b))

    def __call__(self, x, dummy_bs=0):
        # dummy_bs accepted to match the PyTorch call signature (unused here).
        return self._fwd(x, self.w, self.b)


# ----------------------------------------------------------------------------
# myModel: batch-pad DataParallel wrapper (forward semantics reproduced)
# ----------------------------------------------------------------------------
class Opt:
    def __init__(self, batch_size, gpu_ids):
        self.batch_size = batch_size
        self.gpu_ids = gpu_ids


class MyModel:
    def __init__(self, opt, model):
        self.opt = opt
        self.module = model
        # TODO(synk): nn.DataParallel multi-device scatter/gather has no single-kernel
        # Pallas equivalent; the inner model is invoked on one device.
        self.model = model
        # NOTE: parenthesization reproduced exactly as in the PyTorch source
        # (ceil applied before the division) to keep the original semantics,
        # including its non-divisible-batch quirk.
        self.bs_per_gpu = int(np.ceil(float(opt.batch_size)) / len(opt.gpu_ids))
        self.pad_bs = self.bs_per_gpu * len(opt.gpu_ids) - opt.batch_size

    def forward(self, *inputs, **kwargs):
        inputs = self.add_dummy_to_tensor(inputs, self.pad_bs)
        outputs = self.model(*inputs, **kwargs, dummy_bs=self.pad_bs)
        if self.pad_bs == self.bs_per_gpu:
            return self.remove_dummy_from_tensor(outputs, 1)
        return outputs

    def add_dummy_to_tensor(self, tensors, add_size=0):
        # Guard: the original ceil-before-division formula can make pad_bs negative
        # for non-divisible batches; only the non-negative path is well-defined.
        if add_size is None or add_size <= 0 or tensors is None:
            return tensors
        if isinstance(tensors, (list, tuple)):
            return [self.add_dummy_to_tensor(t, add_size) for t in tensors]
        if isinstance(tensors, jnp.ndarray):
            # jnp.pad (prepend zeros on the batch axis) instead of zeros_like+concat.
            # TODO(synk): for the pad_bs > 0 path this pad is still a separate HBM
            # pass; folding the dummy rows into the kernel grid (masked input,
            # dropped OOB writes) would remove it entirely.
            pad_cfg = ((add_size, 0),) + ((0, 0),) * (tensors.ndim - 1)
            tensors = jnp.pad(tensors, pad_cfg)
        return tensors

    def remove_dummy_from_tensor(self, tensors, remove_size=0):
        if remove_size == 0 or tensors is None:
            return tensors
        if isinstance(tensors, (list, tuple)):
            return [self.remove_dummy_from_tensor(t, remove_size) for t in tensors]
        if isinstance(tensors, jnp.ndarray):
            tensors = tensors[remove_size:]
        return tensors

    __call__ = forward


# ----------------------------------------------------------------------------
if __name__ == "__main__":
    key = jax.random.PRNGKey(0)
    k_x, k_m = jax.random.split(key)

    # Small shapes: batch=2, channels=4, spatial=16x16, C_out=8
    N, C_IN, H, W = 2, 4, 16, 16
    C_OUT = 8

    # batch_size divisible by #gpus -> pad_bs == 0 (the well-defined path of the
    # original formula).
    opt = Opt(batch_size=N, gpu_ids=[0, 1])

    inner = InnerConvModel(C_IN, C_OUT, k_m)
    wrapped = MyModel(opt, inner)

    x = jax.random.normal(k_x, (N, C_IN, H, W), jnp.float32)  # NCHW like PyTorch

    out = wrapped(x)
    if isinstance(out, (list, tuple)):
        out = out[0]
    out = jax.block_until_ready(out)

    # Reference check against plain JAX (1x1 conv == channel matmul on NCHW)
    def ref_conv(xx):
        return jnp.maximum(
            jnp.einsum("nchw,oc->nohw", xx, inner.w) + inner.b[None, :, None, None],
            0.0,
        )

    np.testing.assert_allclose(np.asarray(out), np.asarray(ref_conv(x)),
                               rtol=1e-5, atol=1e-5)
    assert out.shape == (N, C_OUT, H, W)

    # Extra check: ragged spatial tail (HW not a multiple of the tile / 128) to
    # exercise the no-pad partial-block path, including multi-tile + partial tail.
    x2 = jax.random.normal(jax.random.PRNGKey(1), (2, C_IN, 20, 20), jnp.float32)
    out2 = jax.block_until_ready(conv1x1_relu(x2, inner.w, inner.b, ts_max=128))
    np.testing.assert_allclose(np.asarray(out2), np.asarray(ref_conv(x2)),
                               rtol=1e-5, atol=1e-5)

    print("KERNEL_OK")
</pallas_src>

<mosaic_0001>
module attributes {stable_mosaic.version = 11 : i64} {
  func.func @_conv1x1_relu_kernel(%arg0: i32, %arg1: i32, %arg2: memref<1x4x256xf32, #tpu.memory_space<vmem>>, %arg3: memref<8x4xf32, #tpu.memory_space<vmem>>, %arg4: memref<8x1xf32, #tpu.memory_space<vmem>>, %arg5: memref<1x8x256xf32, #tpu.memory_space<vmem>>) attributes {dimension_semantics = [#tpu.dimension_semantics<parallel>, #tpu.dimension_semantics<parallel>], iteration_bounds = array<i64: 2, 1>, scalar_prefetch = 0 : i64, scratch_operands = 0 : i64, tpu.core_type = #tpu.core_type<tc>, window_params = [{transform_indices = @transform_0, window_bounds = array<i64: 1, 4, 256>}, {pipeline_mode = #tpu.pipeline_mode<synchronous>, transform_indices = @transform_1, window_bounds = array<i64: 8, 4>}, {pipeline_mode = #tpu.pipeline_mode<synchronous>, transform_indices = @transform_2, window_bounds = array<i64: 8, 1>}, {transform_indices = @transform_3, window_bounds = array<i64: 1, 8, 256>}]} {
    %c0 = arith.constant 0 : index
    %c0_0 = arith.constant 0 : index
    %c0_1 = arith.constant 0 : index
    %0 = vector.load %arg2[%c0, %c0_0, %c0_1] : memref<1x4x256xf32, #tpu.memory_space<vmem>>, vector<1x4x256xf32>
    %1 = vector.shape_cast %0 : vector<1x4x256xf32> to vector<4x256xf32>
    %c0_2 = arith.constant 0 : index
    %c0_3 = arith.constant 0 : index
    %2 = vector.load %arg3[%c0_2, %c0_3] : memref<8x4xf32, #tpu.memory_space<vmem>>, vector<8x4xf32>
    %c0_4 = arith.constant 0 : index
    %c0_5 = arith.constant 0 : index
    %3 = vector.load %arg4[%c0_4, %c0_5] : memref<8x1xf32, #tpu.memory_space<vmem>>, vector<8x1xf32>
    %4 = vector.extract_strided_slice %2 {offsets = [0, 0], sizes = [8, 1], strides = [1, 1]} : vector<8x4xf32> to vector<8x1xf32>
    %5 = vector.extract_strided_slice %1 {offsets = [0, 0], sizes = [1, 256], strides = [1, 1]} : vector<4x256xf32> to vector<1x256xf32>
    %6 = vector.broadcast %4 : vector<8x1xf32> to vector<8x256xf32>
    %7 = vector.broadcast %5 : vector<1x256xf32> to vector<8x256xf32>
    %8 = arith.mulf %6, %7 : vector<8x256xf32>
    %9 = vector.extract_strided_slice %2 {offsets = [0, 1], sizes = [8, 1], strides = [1, 1]} : vector<8x4xf32> to vector<8x1xf32>
    %10 = vector.extract_strided_slice %1 {offsets = [1, 0], sizes = [1, 256], strides = [1, 1]} : vector<4x256xf32> to vector<1x256xf32>
    %11 = vector.broadcast %9 : vector<8x1xf32> to vector<8x256xf32>
    %12 = vector.broadcast %10 : vector<1x256xf32> to vector<8x256xf32>
    %13 = arith.mulf %11, %12 : vector<8x256xf32>
    %14 = arith.addf %8, %13 : vector<8x256xf32>
    %15 = vector.extract_strided_slice %2 {offsets = [0, 2], sizes = [8, 1], strides = [1, 1]} : vector<8x4xf32> to vector<8x1xf32>
    %16 = vector.extract_strided_slice %1 {offsets = [2, 0], sizes = [1, 256], strides = [1, 1]} : vector<4x256xf32> to vector<1x256xf32>
    %17 = vector.broadcast %15 : vector<8x1xf32> to vector<8x256xf32>
    %18 = vector.broadcast %16 : vector<1x256xf32> to vector<8x256xf32>
    %19 = arith.mulf %17, %18 : vector<8x256xf32>
    %20 = arith.addf %14, %19 : vector<8x256xf32>
    %21 = vector.extract_strided_slice %2 {offsets = [0, 3], sizes = [8, 1], strides = [1, 1]} : vector<8x4xf32> to vector<8x1xf32>
    %22 = vector.extract_strided_slice %1 {offsets = [3, 0], sizes = [1, 256], strides = [1, 1]} : vector<4x256xf32> to vector<1x256xf32>
    %23 = vector.broadcast %21 : vector<8x1xf32> to vector<8x256xf32>
    %24 = vector.broadcast %22 : vector<1x256xf32> to vector<8x256xf32>
    %25 = arith.mulf %23, %24 : vector<8x256xf32>
    %26 = arith.addf %20, %25 : vector<8x256xf32>
    %27 = vector.broadcast %3 : vector<8x1xf32> to vector<8x256xf32>
    %28 = arith.addf %26, %27 : vector<8x256xf32>
    %cst = arith.constant 0.000000e+00 : f32
    %29 = vector.broadcast %cst : f32 to vector<8x256xf32>
    %30 = arith.maximumf %28, %29 : vector<8x256xf32>
    %c0_6 = arith.constant 0 : index
    %c0_7 = arith.constant 0 : index
    %c0_8 = arith.constant 0 : index
    %31 = vector.load %arg5[%c0_6, %c0_7, %c0_8] : memref<1x8x256xf32, #tpu.memory_space<vmem>>, vector<1x8x256xf32>
    %32 = vector.shape_cast %31 : vector<1x8x256xf32> to vector<8x256xf32>
    %33 = vector.shape_cast %30 : vector<8x256xf32> to vector<1x8x256xf32>
    tpu.vector_store %arg5[%c0_6, %c0_7, %c0_8], %33 {strides = array<i32>} : memref<1x8x256xf32, #tpu.memory_space<vmem>>, vector<1x8x256xf32>,
    return
  }
  func.func @transform_0(%arg0: i32, %arg1: i32) -> (i32, i32, i32) {
    %c0_i32 = arith.constant 0 : i32
    %c0_i32_0 = arith.constant 0 : i32
    return %arg0, %c0_i32, %arg1 : i32, i32, i32
  }
  func.func @transform_1(%arg0: i32, %arg1: i32) -> (i32, i32) {
    %c0_i32 = arith.constant 0 : i32
    %c0_i32_0 = arith.constant 0 : i32
    %c0_i32_1 = arith.constant 0 : i32
    return %c0_i32, %c0_i32_0 : i32, i32
  }
  func.func @transform_2(%arg0: i32, %arg1: i32) -> (i32, i32) {
    %c0_i32 = arith.constant 0 : i32
    %c0_i32_0 = arith.constant 0 : i32
    %c0_i32_1 = arith.constant 0 : i32
    return %c0_i32, %c0_i32_0 : i32, i32
  }
  func.func @transform_3(%arg0: i32, %arg1: i32) -> (i32, i32, i32) {
    %c0_i32 = arith.constant 0 : i32
    %c0_i32_0 = arith.constant 0 : i32
    return %arg0, %c0_i32, %arg1 : i32, i32, i32
  }
}

</mosaic_0001>

<bundles_post_ra>
// kernel: _lambda_.1
= control target key start
LH: loop header
LB: loop body
LE: loop exit
PB: predicated region body
PF: predicated region fallthrough
CT: control target
= control target key end

     0   :  { %s510_s12 = smov 0   ;;  %s512_s13 = smov 0   ;;  %s553_s0 = inlined_call_operand.vmem [shape: f32[2,4,256], index: 0, kind: input, shape index: {}]   ;;  %s554_s1 = inlined_call_operand.vmem [shape: f32[8,4], index: 1, kind: input, shape index: {}]   ;;  %s555_s2 = inlined_call_operand.vmem [shape: f32[8,1], index: 2, kind: input, shape index: {}]   ;;  %s556_s3 = inlined_call_operand.vmem [shape: f32[2,8,256], index: 3, kind: output, shape index: {}]  }
   0x1   :  { %s514_s14 = smov 0  }
   0x2 LB: > { %s25_s15 = sadd.s32 1, %s480_s13  ;;  %p419_p0 = scmp.ge.s32.totalorder %s484_s14, 1  ;;  %s484_s14 = sphi %s514_s14, %s13_s14   ;;  %s480_s13 = sphi %s512_s13, %s558_s13   ;;  %s476_s12 = sphi %s510_s12, %s557_s12  }
   0x3   : > { %p27_p1 = scmp.ge.s32.totalorder %s25_s15, 2  ;;  %p158_p2 = scmp.lt.s32.totalorder %s484_s14, 3 }
   0x5   : > { %s560_s15 = smov (%p27_p1, %s25_s15), 0  ;;  %p159_p3 = pnand %p419_p0, %p158_p2 }
   0x6   : > { %v211_v0 = vld [vmem:[%s554_s1] sm:$0xff] (!%p159_p3)  ;;  %v486_v1 = vmov (!%p159_p3), 0   ;;  %v487_v2 = vmov (!%p159_p3), 2   ;;  %v488_v3 = vmov (!%p159_p3), 1   ;;  %v489_v4 = vmov (!%p159_p3), 3   ;;  %p191_p4 = scmp.lt.s32.totalorder (!%p159_p3), %s476_s12, 1 }
   0x7   : > { %162 = sbr.rel (%p159_p3) target bundleno = 154 (0x9a), region = 32  ;;  %456 = vset.pattern.permute.xlu0 (!%p159_p3), %v486_v1  ;;  %458 = vset.pattern.permute.xlu1 (!%p159_p3), %v487_v2  ;;  %v212_v5 = vld [vmem:[%s555_s2] sm:$0xff] (!%p159_p3)  ;;  %v219_v6 = vlaneseq (!%p159_p3) }
   0x8   : > { %215 = vperm.xlu0 (!%p159_p3), %456, %v211_v0   ;;  %266 = vperm.xlu1 (!%p159_p3), %458, %v211_v0  }
   0x9   : > { %v220_v7 = vshrl.u32 (!%p159_p3), %v219_v6, 7 }
   0xb   : > { %v221_v8 = vsub.s32 (!%p159_p3), 0, %v220_v7  ;;  %v225_v9 = vsub.s32 (!%p159_p3), 4, %v220_v7  ;;  %v245_v10 = vsub.s32 (!%p159_p3), 1, %v220_v7  ;;  %v249_v11 = vsub.s32 (!%p159_p3), 5, %v220_v7 }
   0xc   : > { %457 = vset.pattern.permute.xlu0 (!%p159_p3), %v488_v3  ;;  %459 = vset.pattern.permute.xlu1 (!%p159_p3), %v489_v4  ;;  %v271_v13 = vsub.s32 (!%p159_p3), 2, %v220_v7  ;;  %v275_v14 = vsub.s32 (!%p159_p3), 6, %v220_v7  ;;  %v297_v15 = vsub.s32 (!%p159_p3), 3, %v220_v7  ;;  %v301_v16 = vsub.s32 (!%p159_p3), 7, %v220_v7 }
   0xd   : > { %240 = vperm.xlu0 (!%p159_p3), %457, %v211_v0   ;;  %292 = vperm.xlu1 (!%p159_p3), %459, %v211_v0  }
   0xe   : > { %s562_s12 = smov (!%p191_p4, %s476_s12), 1 }
   0xf   : > { %s426_s20 = sshll.u32 %s562_s12, 3  ;;  %s427_s24 = sshll.u32 %s562_s12, 4 }
  0x10   : > { %s198_s23 = scalar_lea.vmem %s553_s0, %s426_s20  ;;  %s208_s27 = scalar_lea.vmem %s556_s3, %s427_s24 }
  0x11   : > { %460 = vset.pattern.permute.xlu1 %v486_v1  ;;  %461 = vset.pattern.permute.xlu0 %v486_v1  ;;  %v210_v12 = vld [vmem:[%s198_s23] sm:$0xff] }
  0x12   : > { %319 = vperm.xlu1 %460, %v212_v5   ;;  %v222_v17 = vrot.slane %v210_v12, %v221_v8  ;;  %v226_v18 = vrot.slane %v210_v12, %v225_v9  ;;  %v246_v19 = vrot.slane %v210_v12, %v245_v10  ;;  %v250_v20 = vrot.slane %v210_v12, %v249_v11 }
  0x13   : > { %v272_v21 = vrot.slane %v210_v12, %v271_v13  ;;  %v276_v22 = vrot.slane %v210_v12, %v275_v14  ;;  %v298_v25 = vrot.slane %v210_v12, %v297_v15  ;;  %v302_v26 = vrot.slane %v210_v12, %v301_v16 }
  0x14   : > { %v232_v27 = vrot.slane %v222_v17, %v221_v8  ;;  %v236_v28 = vrot.slane %v226_v18, %v221_v8  ;;  %v256_v29 = vrot.slane %v246_v19, %v245_v10  ;;  %v260_v30 = vrot.slane %v250_v20, %v245_v10 }
  0x15   : > { %v282_v31 = vrot.slane %v272_v21, %v271_v13  ;;  %v286_v32 = vrot.slane %v276_v22, %v271_v13  ;;  %v308_v33 = vrot.slane %v298_v25, %v297_v15  ;;  %v312_v34 = vrot.slane %v302_v26, %v297_v15 }
  0x87   : > { %v216_v23 = vpop.permute.xlu0 %215  ;;  %v267_v24 = vpop.permute.xlu1 %266 }
  0x88   : > { %v237_v37 = vmul.f32 %v232_v27, %v216_v23  ;;  %v238_v38 = vmul.f32 %v236_v28, %v216_v23  ;;  %v287_v41 = vmul.f32 %v282_v31, %v267_v24  ;;  %v288_v42 = vmul.f32 %v286_v32, %v267_v24 }
  0x8c   : > { %v241_v35 = vpop.permute.xlu0 %240  ;;  %v293_v36 = vpop.permute.xlu1 %292 }
  0x8d   : > { %v261_v39 = vmul.f32 %v256_v29, %v241_v35  ;;  %v262_v40 = vmul.f32 %v260_v30, %v241_v35  ;;  %v313_v45 = vmul.f32 %v308_v33, %v293_v36  ;;  %v314_v46 = vmul.f32 %v312_v34, %v293_v36 }
  0x8f   : > { %v263_v43 = vadd.f32 %v261_v39, %v237_v37  ;;  %v264_v44 = vadd.f32 %v262_v40, %v238_v38 }
  0x91   : > { %v289_v47 = vadd.f32 %v287_v41, %v263_v43  ;;  %v290_v48 = vadd.f32 %v288_v42, %v264_v44  ;;  %v320_v49 = vpop.permute.xlu1 %319 }
  0x93   : > { %v315_v50 = vadd.f32 %v313_v45, %v289_v47  ;;  %v316_v51 = vadd.f32 %v314_v46, %v290_v48 }
  0x95   : > { %v322_v52 = vadd.f32 %v320_v49, %v315_v50  ;;  %v323_v53 = vadd.f32 %v320_v49, %v316_v51 }
  0x97   : > { %v324_v54 = vmax.f32 %v322_v52, 0.0  ;;  %v325_v55 = vmax.f32 %v323_v53, 0.0 }
  0x99   : > { %326 = vst [vmem:[%s208_s27] sm:$0xff] %v324_v54  ;;  %327 = vst [vmem:[%s208_s27 + $0x8] sm:$0xff] %v325_v55 }
  0x9a PF: > { %s13_s14 = sadd.s32 1, %s484_s14   ;;  %s557_s12 = smov %s480_s13 }
  0x9b   : > { %p10_p5 = scmp.ge.s32.totalorder %s13_s14, 4   ;;  %s558_s13 = smov %s560_s15 }
  0x9d   :  { %12 = sbr.rel (!%p10_p5) target bundleno = 2 (0x2), region = 62 }

</bundles_post_ra>
